<compile_context>
chip_gen: v5e
topology: v5e:2x2
jax: 0.10.0
libtpu: 0.0.40
codegen_flags: <defaults>
</compile_context>

<pallas_src>
import jax
import jax.numpy as jnp
from jax.experimental import pallas as pl
from jax.experimental.pallas import tpu as pltpu


def policy_kernel(x_ref, w1_ref, b1_ref, w2_ref, b2_ref, w3_ref, b3_ref, out_ref):
    # x_ref:  (F, TB)  f32  -- batch on the lane axis
    # w*_ref: (out, in)     -- f32 or bf16 (PyTorch Linear layout)
    # b*_ref: (out, 1) f32
    # out_ref: (1, TB) int32 -- lane-dense action indices
    wd = w1_ref.dtype
    x = x_ref[...].astype(wd)

    # --- MLP hot path: three MXU matmuls (f32 accumulate) + tanh on EUP ---
    h1 = jnp.tanh(
        jnp.dot(w1_ref[...], x, preferred_element_type=jnp.float32) + b1_ref[...]
    )                                                            # (H, TB) f32
    h2 = jnp.tanh(
        jnp.dot(w2_ref[...], h1.astype(wd), preferred_element_type=jnp.float32)
        + b2_ref[...]
    )                                                            # (H, TB) f32
    logits = (
        jnp.dot(w3_ref[...], h2.astype(wd), preferred_element_type=jnp.float32)
        + b3_ref[...]
    )                                                            # (A, TB) f32

    # --- argmax over actions (sublane axis); softmax dropped (monotonic) ---
    n_actions = logits.shape[0]
    row = jax.lax.broadcasted_iota(jnp.int32, logits.shape, dimension=0)
    m = jnp.max(logits, axis=0, keepdims=True)                   # (1, TB)
    idx_or_sentinel = jnp.where(logits == m, row, jnp.int32(n_actions))
    out_ref[...] = jnp.min(idx_or_sentinel, axis=0, keepdims=True)  # first occurrence


def frame_stack_policy_forward(x, params, *, block_b=512):
    """x: (B, n_feats) float32. params: w1,b1,w2,b2,w3,b3; w* are (out, in),
    b* are (out, 1). Weights may be f32 or bf16; biases stay f32.
    Returns (B,) int32 action indices."""
    B, F = x.shape
    w1, b1 = params["w1"], params["b1"]
    w2, b2 = params["w2"], params["b2"]
    w3, b3 = params["w3"], params["b3"]

    # Batch tile: whole batch if small, otherwise a 128-multiple tile so the
    # lane dim of every block satisfies the (8, 128) constraint.
    if B <= block_b:
        tb, bp = B, B
    else:
        tb = block_b                      # multiple of 128
        bp = pl.cdiv(B, tb) * tb

    # Layout plumbing (not compute): present batch on the lane axis.
    xt = x.T                              # (F, B)
    if bp != B:
        xt = jnp.pad(xt, ((0, 0), (0, bp - B)))

    grid = (bp // tb,)
    const = lambda a: pl.BlockSpec(a.shape, lambda i: (0,) * a.ndim)

    out = pl.pallas_call(
        policy_kernel,
        out_shape=jax.ShapeDtypeStruct((1, bp), jnp.int32),
        grid=grid,
        in_specs=[
            pl.BlockSpec((F, tb), lambda i: (0, i)),   # x^T tile per grid step
            const(w1), const(b1),                      # weights/biases: resident
            const(w2), const(b2),
            const(w3), const(b3),
        ],
        out_specs=pl.BlockSpec((1, tb), lambda i: (0, i)),  # lane-dense actions
        compiler_params=pltpu.CompilerParams(
            dimension_semantics=("parallel",),          # megacore on v7x
        ),
    )(xt, w1, b1, w2, b2, w3, b3)
    return out[0, :B]                                   # (B,) int32


def init_params(key, n_feats, n_actions, hidden_size, weight_dtype=jnp.float32):
    """Deterministic synthetic parameters in PyTorch Linear layout:
    weights (out, in), biases (out, 1). Biases kept f32."""
    ks = jax.random.split(key, 6)

    def lin(kw, kb, fan_in, fan_out):
        bound = 1.0 / jnp.sqrt(fan_in)
        w = jax.random.uniform(kw, (fan_out, fan_in), jnp.float32, -bound, bound)
        b = jax.random.uniform(kb, (fan_out, 1), jnp.float32, -bound, bound)
        return w.astype(weight_dtype), b

    w1, b1 = lin(ks[0], ks[1], n_feats, hidden_size)
    w2, b2 = lin(ks[2], ks[3], hidden_size, hidden_size)
    w3, b3 = lin(ks[4], ks[5], hidden_size, n_actions)
    return dict(w1=w1, b1=b1, w2=w2, b2=b2, w3=w3, b3=b3)


def reference_forward(x, params):
    """Pure-JAX reference of the PyTorch forward (softmax kept for fidelity)."""
    w1 = params["w1"].astype(jnp.float32)
    w2 = params["w2"].astype(jnp.float32)
    w3 = params["w3"].astype(jnp.float32)
    h1 = jnp.tanh(x @ w1.T + params["b1"][:, 0])
    h2 = jnp.tanh(h1 @ w2.T + params["b2"][:, 0])
    logits = h2 @ w3.T + params["b3"][:, 0]
    probs = jax.nn.softmax(logits, axis=-1)
    return jnp.argmax(probs, axis=-1).astype(jnp.int32)


if __name__ == "__main__":
    key = jax.random.PRNGKey(0)
    B, n_feats, n_actions, hidden = 8, 16, 8, 32

    k_params, k_x = jax.random.split(key)
    params = init_params(k_params, n_feats, n_actions, hidden)
    x = jax.random.normal(k_x, (B, n_feats), jnp.float32)

    actions = jax.block_until_ready(frame_stack_policy_forward(x, params))
    ref = reference_forward(x, params)
    assert actions.shape == (B,)
    assert actions.dtype == jnp.int32
    assert bool(jnp.all(actions == ref)), (actions, ref)

    # bf16-weight path (v6e/v7x MXU-native rate, half the weight DMA bytes);
    # accumulation and all elementwise math stay f32 inside the kernel.
    params_bf16 = {k: (v.astype(jnp.bfloat16) if k.startswith("w") else v)
                   for k, v in params.items()}
    actions_bf16 = jax.block_until_ready(
        frame_stack_policy_forward(x, params_bf16))
    assert actions_bf16.shape == (B,)
    assert actions_bf16.dtype == jnp.int32

    print("KERNEL_OK")
</pallas_src>

<mosaic_0001>
module attributes {stable_mosaic.version = 11 : i64} {
  func.func @policy_kernel(%arg0: i32, %arg1: memref<16x8xf32, #tpu.memory_space<vmem>>, %arg2: memref<32x16xf32, #tpu.memory_space<vmem>>, %arg3: memref<32x1xf32, #tpu.memory_space<vmem>>, %arg4: memref<32x32xf32, #tpu.memory_space<vmem>>, %arg5: memref<32x1xf32, #tpu.memory_space<vmem>>, %arg6: memref<8x32xf32, #tpu.memory_space<vmem>>, %arg7: memref<8x1xf32, #tpu.memory_space<vmem>>, %arg8: memref<1x8xi32, #tpu.memory_space<vmem>>) attributes {dimension_semantics = [#tpu.dimension_semantics<parallel>], iteration_bounds = array<i64: 1>, scalar_prefetch = 0 : i64, scratch_operands = 0 : i64, tpu.core_type = #tpu.core_type<tc>, window_params = [{transform_indices = @transform_0, window_bounds = array<i64: 16, 8>}, {pipeline_mode = #tpu.pipeline_mode<synchronous>, transform_indices = @transform_1, window_bounds = array<i64: 32, 16>}, {pipeline_mode = #tpu.pipeline_mode<synchronous>, transform_indices = @transform_2, window_bounds = array<i64: 32, 1>}, {pipeline_mode = #tpu.pipeline_mode<synchronous>, transform_indices = @transform_3, window_bounds = array<i64: 32, 32>}, {pipeline_mode = #tpu.pipeline_mode<synchronous>, transform_indices = @transform_4, window_bounds = array<i64: 32, 1>}, {pipeline_mode = #tpu.pipeline_mode<synchronous>, transform_indices = @transform_5, window_bounds = array<i64: 8, 32>}, {pipeline_mode = #tpu.pipeline_mode<synchronous>, transform_indices = @transform_6, window_bounds = array<i64: 8, 1>}, {transform_indices = @transform_7, window_bounds = array<i64: 1, 8>}]} {
    %c0 = arith.constant 0 : index
    %c0_0 = arith.constant 0 : index
    %0 = vector.load %arg1[%c0, %c0_0] : memref<16x8xf32, #tpu.memory_space<vmem>>, vector<16x8xf32>
    %c0_1 = arith.constant 0 : index
    %c0_2 = arith.constant 0 : index
    %1 = vector.load %arg2[%c0_1, %c0_2] : memref<32x16xf32, #tpu.memory_space<vmem>>, vector<32x16xf32>
    %cst = arith.constant dense<0.000000e+00> : vector<32x8xf32>
    %2 = tpu.matmul %1, %0, %cst {dimension_numbers = #tpu.dot_dimension_numbers<[1], [0], [0], [1], [0, 0, 1, 1], [], []>} : vector<32x16xf32>, vector<16x8xf32>, vector<32x8xf32> -> vector<32x8xf32>
    %c0_3 = arith.constant 0 : index
    %c0_4 = arith.constant 0 : index
    %3 = vector.load %arg3[%c0_3, %c0_4] : memref<32x1xf32, #tpu.memory_space<vmem>>, vector<32x1xf32>
    %4 = vector.broadcast %3 : vector<32x1xf32> to vector<32x8xf32>
    %5 = arith.addf %2, %4 : vector<32x8xf32>
    %6 = math.tanh %5 : vector<32x8xf32>
    %c0_5 = arith.constant 0 : index
    %c0_6 = arith.constant 0 : index
    %7 = vector.load %arg4[%c0_5, %c0_6] : memref<32x32xf32, #tpu.memory_space<vmem>>, vector<32x32xf32>
    %cst_7 = arith.constant dense<0.000000e+00> : vector<32x8xf32>
    %8 = tpu.matmul %7, %6, %cst_7 {dimension_numbers = #tpu.dot_dimension_numbers<[1], [0], [0], [1], [0, 0, 1, 1], [], []>} : vector<32x32xf32>, vector<32x8xf32>, vector<32x8xf32> -> vector<32x8xf32>
    %c0_8 = arith.constant 0 : index
    %c0_9 = arith.constant 0 : index
    %9 = vector.load %arg5[%c0_8, %c0_9] : memref<32x1xf32, #tpu.memory_space<vmem>>, vector<32x1xf32>
    %10 = vector.broadcast %9 : vector<32x1xf32> to vector<32x8xf32>
    %11 = arith.addf %8, %10 : vector<32x8xf32>
    %12 = math.tanh %11 : vector<32x8xf32>
    %c0_10 = arith.constant 0 : index
    %c0_11 = arith.constant 0 : index
    %13 = vector.load %arg6[%c0_10, %c0_11] : memref<8x32xf32, #tpu.memory_space<vmem>>, vector<8x32xf32>
    %cst_12 = arith.constant dense<0.000000e+00> : vector<8x8xf32>
    %14 = tpu.matmul %13, %12, %cst_12 {dimension_numbers = #tpu.dot_dimension_numbers<[1], [0], [0], [1], [0, 0, 1, 1], [], []>} : vector<8x32xf32>, vector<32x8xf32>, vector<8x8xf32> -> vector<8x8xf32>
    %c0_13 = arith.constant 0 : index
    %c0_14 = arith.constant 0 : index
    %15 = vector.load %arg7[%c0_13, %c0_14] : memref<8x1xf32, #tpu.memory_space<vmem>>, vector<8x1xf32>
    %16 = vector.broadcast %15 : vector<8x1xf32> to vector<8x8xf32>
    %17 = arith.addf %14, %16 : vector<8x8xf32>
    %18 = tpu.iota {dimensions = array<i32: 0>} : vector<8x8xi32>
    %cst_15 = arith.constant dense<0xFF800000> : vector<8xf32>
    %19 = vector.multi_reduction <maximumf>, %17, %cst_15 [0] : vector<8x8xf32> to vector<8xf32>
    %20 = vector.shape_cast %19 : vector<8xf32> to vector<1x8xf32>
    %21 = vector.broadcast %20 : vector<1x8xf32> to vector<8x8xf32>
    %22 = arith.cmpf oeq, %17, %21 : vector<8x8xf32>
    %c8_i32 = arith.constant 8 : i32
    %23 = vector.broadcast %c8_i32 : i32 to vector<8x8xi32>
    %24 = arith.select %22, %18, %23 : vector<8x8xi1>, vector<8x8xi32>
    %cst_16 = arith.constant dense<2147483647> : vector<8xi32>
    %25 = vector.multi_reduction <minsi>, %24, %cst_16 [0] : vector<8x8xi32> to vector<8xi32>
    %26 = vector.shape_cast %25 : vector<8xi32> to vector<1x8xi32>
    %c0_17 = arith.constant 0 : index
    %c0_18 = arith.constant 0 : index
    %27 = vector.load %arg8[%c0_17, %c0_18] : memref<1x8xi32, #tpu.memory_space<vmem>>, vector<1x8xi32>
    tpu.vector_store %arg8[%c0_17, %c0_18], %26 {strides = array<i32>} : memref<1x8xi32, #tpu.memory_space<vmem>>, vector<1x8xi32>,
    return
  }
  func.func @transform_0(%arg0: i32) -> (i32, i32) {
    %c0_i32 = arith.constant 0 : i32
    %c0_i32_0 = arith.constant 0 : i32
    return %c0_i32, %arg0 : i32, i32
  }
  func.func @transform_1(%arg0: i32) -> (i32, i32) {
    %c0_i32 = arith.constant 0 : i32
    %c0_i32_0 = arith.constant 0 : i32
    %c0_i32_1 = arith.constant 0 : i32
    return %c0_i32, %c0_i32_0 : i32, i32
  }
  func.func @transform_2(%arg0: i32) -> (i32, i32) {
    %c0_i32 = arith.constant 0 : i32
    %c0_i32_0 = arith.constant 0 : i32
    %c0_i32_1 = arith.constant 0 : i32
    return %c0_i32, %c0_i32_0 : i32, i32
  }
  func.func @transform_3(%arg0: i32) -> (i32, i32) {
    %c0_i32 = arith.constant 0 : i32
    %c0_i32_0 = arith.constant 0 : i32
    %c0_i32_1 = arith.constant 0 : i32
    return %c0_i32, %c0_i32_0 : i32, i32
  }
  func.func @transform_4(%arg0: i32) -> (i32, i32) {
    %c0_i32 = arith.constant 0 : i32
    %c0_i32_0 = arith.constant 0 : i32
    %c0_i32_1 = arith.constant 0 : i32
    return %c0_i32, %c0_i32_0 : i32, i32
  }
  func.func @transform_5(%arg0: i32) -> (i32, i32) {
    %c0_i32 = arith.constant 0 : i32
    %c0_i32_0 = arith.constant 0 : i32
    %c0_i32_1 = arith.constant 0 : i32
    return %c0_i32, %c0_i32_0 : i32, i32
  }
  func.func @transform_6(%arg0: i32) -> (i32, i32) {
    %c0_i32 = arith.constant 0 : i32
    %c0_i32_0 = arith.constant 0 : i32
    %c0_i32_1 = arith.constant 0 : i32
    return %c0_i32, %c0_i32_0 : i32, i32
  }
  func.func @transform_7(%arg0: i32) -> (i32, i32) {
    %c0_i32 = arith.constant 0 : i32
    %c0_i32_0 = arith.constant 0 : i32
    return %c0_i32, %arg0 : i32, i32
  }
}

</mosaic_0001>

<bundles_post_ra>
// kernel: tpu_custom_call.1
= control target key start
LH: loop header
LB: loop body
LE: loop exit
PB: predicated region body
PF: predicated region fallthrough
CT: control target
= control target key end

     0   :  { %vm57_vm0 = vcmask 130048   ;;  %v313_v3 = vmov 0   ;;  %s427_s0 = inlined_call_operand.vmem [shape: f32[16,8], index: 0, kind: input, shape index: {}]   ;;  %s428_s1 = inlined_call_operand.vmem [shape: f32[32,16], index: 1, kind: input, shape index: {}]   ;;  %s429_s2 = inlined_call_operand.vmem [shape: f32[32,1], index: 2, kind: input, shape index: {}]   ;;  %s430_s3 = inlined_call_operand.vmem [shape: f32[32,32], index: 3, kind: input, shape index: {}]   ;;  %s431_s4 = inlined_call_operand.vmem [shape: f32[32,1], index: 4, kind: input, shape index: {}]   ;;  %s432_s5 = inlined_call_operand.vmem [shape: f32[8,32], index: 5, kind: input, shape index: {}]   ;;  %s433_s6 = inlined_call_operand.vmem [shape: f32[8,1], index: 6, kind: input, shape index: {}]   ;;  %s434_s7 = inlined_call_operand.hbm [shape: s32[1,8], index: 7, kind: output, shape index: {}]  }
   0x1   :  { %v28_v0 = vld [vmem:[%s427_s0 + $0x8] sm:$0xff]  ;;  %v27_v1 = vld [vmem:[%s427_s0] sm:$0xff]  ;;  %269 = vset.pattern.permute.xlu1 %v313_v3  ;;  %v36_v4 = vld [vmem:[%s429_s2 + $0x18] sm:$0xff]  ;;  %268 = vset.pattern.permute.xlu0 %v313_v3 }
   0x2   :  { %84 = vmatpush.msra.mxu0 %v28_v0  ;;  %v29_v2 = vld [vmem:[%s428_s1] sm:$0xff]  ;;  %v34_v5 = vld [vmem:[%s429_s2 + $0x8] sm:$0xff]  ;;  %54 = vperm.xlu0 %268, %v36_v4   ;;  %v32_v6 = vld [vmem:[%s428_s1 + $0x18] sm:$0xff] }
   0x3   :  { %44 = vperm.xlu1 %269, %v34_v5   ;;  %256 = vmatpush.msra.mxu1 %v28_v0 }
   0x4   :  { %85 = vmatpush.msra.mxu0 %v27_v1 }
   0x5   :  { %247 = vmatmul.msk.f32.vlgmr.msra.gmra.mxu0 %vm57_vm0, %v29_v2 }
   0x6   :  { %12 = vsyncpa [#allocation3], 0  ;;  %270 = vset.pattern.permute.xlu2 %v313_v3  ;;  %257 = vmatpush.msra.mxu1 %v27_v1  ;;  %v33_v7 = vld [vmem:[%s429_s2] sm:$0xff]  ;;  %v35_v8 = vld [vmem:[%s429_s2 + $0x10] sm:$0xff]  ;;  %vm131_vm1 = vcmask 261120   ;;  %vm209_vm2 = vcmask 64512   ;;  %v207_v60 = vlaneseq }
   0x7   :  { %250 = vmatmul.msk.f32.vlgmr.msra.gmra.mxu1 %vm57_vm0, %v32_v6  ;;  %v30_v9 = vld [vmem:[%s428_s1 + $0x8] sm:$0xff]  ;;  %v107_v10 = vld [vmem:[%s431_s4] sm:$0xff]  ;;  %v31_v12 = vld [vmem:[%s428_s1 + $0x10] sm:$0xff]  ;;  %s238_s14 = sshll.u32 %s434_s7, 4  ;;  %vm229_vm6 = vcmask 57344   ;;  %s239_s14 = int_to_ptr.hbm [resolvable:$true] %s238_s14 }
   0x8   :  { %v108_v11 = vld [vmem:[%s431_s4 + $0x8] sm:$0xff]  ;;  %v110_v19 = vld [vmem:[%s431_s4 + $0x18] sm:$0xff]  ;;  %v109_v21 = vld [vmem:[%s431_s4 + $0x10] sm:$0xff]  ;;  %v208_v63 = vshrl.u32 %v207_v60, 7 }
   0x9   :  { %128 = vperm.xlu2 %270, %v110_v19   ;;  %v178_v28 = vld [vmem:[%s433_s6] sm:$0xff]  ;;  %v104_v33 = vld [vmem:[%s430_s3 + $0x8] sm:$0xff]  ;;  %v105_v34 = vld [vmem:[%s430_s3 + $0x10] sm:$0xff] }
   0xa   :  { %49 = vperm.xlu0 %268, %v35_v8   ;;  %v103_v31 = vld [vmem:[%s430_s3] sm:$0xff]  ;;  %v106_v35 = vld [vmem:[%s430_s3 + $0x18] sm:$0xff] }
   0xb   :  { %39 = vperm.xlu1 %269, %v33_v7   ;;  %v177_v51 = vld [vmem:[%s432_s5] sm:$0xff]  ;;  %s314_s5 = smov [#allocation2]  }
   0xc   :  { %s236_s11 = sshll.u32 %s314_s5, 4  ;;  %s237_s11 = int_to_ptr.vmem [resolvable:$true] %s236_s11 }
   0xd   :  { %248 = vmatmul.msk.f32.gmra.mxu0 %vm57_vm0, %v30_v9 }
  0x11   :  { %123 = vperm.xlu2 %270, %v109_v21  }
  0x12   :  { %118 = vperm.xlu0 %268, %v108_v11  }
  0x13   :  { %113 = vperm.xlu1 %269, %v107_v10  }
  0x15   :  { %249 = vmatmul.msk.f32.gmra.mxu0 %vm57_vm0, %v31_v12 }
  0x19   :  { %181 = vperm.xlu2 %270, %v178_v28  }
  0x63   :  { %v129_v36 = vpop.permute.xlu2 %128 }
  0x6b   :  { %v124_v38 = vpop.permute.xlu2 %123 }
  0x73   :  { %v182_v53 = vpop.permute.xlu2 %181 }
  0x74   :  { %v55_v14 = vpop.permute.xlu0 %54 }
  0x75   :  { %v45_v17 = vpop.permute.xlu1 %44 }
  0x7c   :  { %v50_v23 = vpop.permute.xlu0 %49 }
  0x7d   :  { %v40_v22 = vpop.permute.xlu1 %39 }
  0x82   :  { %v87_v13 = vpop.f32.mrf.mxu0 }
  0x83   :  { %v88_v27 = vadd.f32 %v87_v13, %v40_v22 }
  0x84   :  { %v96_v15 = vpop.f32.mrf.mxu1  ;;  %v119_v43 = vpop.permute.xlu0 %118 }
  0x85   :  { %v97_v16 = vadd.f32 %v96_v15, %v55_v14  ;;  %v114_v46 = vpop.permute.xlu1 %113 }
  0x87   :  { %271 = vtanh.f32 %v97_v16 }
  0x8a   :  { %v90_v18 = vpop.f32.mrf.mxu0 }
  0x8b   :  { %v91_v25 = vadd.f32 %v90_v18, %v45_v17 }
  0x8d   :  { %v272_v20 = vpop.eup %271 }
  0x8e   :  { %156 = vmatpush.msrb.mxu1 %v272_v20  ;;  %258 = vmatpush.msra.mxu2 %v272_v20 }
  0x8f   :  { %259 = vmatpush.msra.mxu3 %v272_v20 }
  0x92   :  { %v93_v24 = vpop.f32.mrf.mxu0 }
  0x93   :  { %v94_v26 = vadd.f32 %v93_v24, %v50_v23 }
  0x95   :  { %273 = vtanh.f32 %v94_v26 }
  0x96   :  { %275 = vtanh.f32 %v91_v25 }
  0x97   :  { %277 = vtanh.f32 %v88_v27 }
  0x9b   :  { %v274_v29 = vpop.eup %273 }
  0x9c   :  { %157 = vmatpush.msrb.mxu1 %v274_v29  ;;  %260 = vmatpush.msra.mxu2 %v274_v29  ;;  %v276_v30 = vpop.eup %275 }
  0x9d   :  { %261 = vmatpush.msra.mxu3 %v274_v29  ;;  %v278_v32 = vpop.eup %277 }
  0x9e   :  { %158 = vmatpush.msrb.mxu1 %v276_v30  ;;  %262 = vmatpush.msra.mxu2 %v276_v30 }
  0x9f   :  { %263 = vmatpush.msra.mxu3 %v276_v30 }
  0xa0   :  { %159 = vmatpush.msrb.mxu1 %v278_v32  ;;  %264 = vmatpush.msra.mxu2 %v278_v32 }
  0xa1   :  { %265 = vmatpush.msra.mxu3 %v278_v32  ;;  %251 = vmatmul.msk.f32.vlgmr.msrb.gmra.mxu1 %vm131_vm1, %v103_v31 }
  0xa2   :  { %252 = vmatmul.msk.f32.vlgmr.msra.gmra.mxu2 %vm131_vm1, %v104_v33  ;;  %253 = vmatmul.msk.f32.vlgmr.msra.gmra.mxu3 %vm131_vm1, %v105_v34 }
  0xaa   :  { %254 = vmatmul.msk.f32.gmra.mxu3 %vm131_vm1, %v106_v35 }
 0x11e   :  { %v161_v44 = vpop.f32.mrf.mxu1 }
 0x11f   :  { %v162_v47 = vadd.f32 %v161_v44, %v114_v46 }
 0x125   :  { %v167_v37 = vpop.f32.mrf.mxu3  ;;  %v164_v39 = vpop.f32.mrf.mxu2 }
 0x126   :  { %v168_v41 = vadd.f32 %v167_v37, %v124_v38  ;;  %v165_v45 = vadd.f32 %v164_v39, %v119_v43 }
 0x12d   :  { %v170_v40 = vpop.f32.mrf.mxu3 }
 0x12e   :  { %v171_v42 = vadd.f32 %v170_v40, %v129_v36 }
 0x130   :  { %279 = vtanh.f32 %v171_v42 }
 0x131   :  { %281 = vtanh.f32 %v168_v41 }
 0x132   :  { %283 = vtanh.f32 %v165_v45 }
 0x133   :  { %285 = vtanh.f32 %v162_v47 }
 0x136   :  { %v280_v48 = vpop.eup %279 }
 0x137   :  { %199 = vmatpush.msrb.mxu2 %v280_v48  ;;  %v282_v49 = vpop.eup %281 }
 0x138   :  { %v284_v50 = vpop.eup %283 }
 0x139   :  { %200 = vmatpush.msrb.mxu2 %v282_v49  ;;  %v286_v52 = vpop.eup %285 }
 0x13b   :  { %201 = vmatpush.msrb.mxu2 %v284_v50 }
 0x13d   :  { %202 = vmatpush.msrb.mxu2 %v286_v52 }
 0x13e   :  { %255 = vmatmul.msk.f32.vlgmr.msrb.gmra.mxu2 %vm131_vm1, %v177_v51 }
 0x1c1   :  { %v204_v54 = vpop.f32.mrf.mxu2 }
 0x1c2   :  { %v205_v55 = vadd.f32 %v204_v54, %v182_v53 }
 0x1c4   :  { %v210_v56 = vsel %vm209_vm2, %v205_v55, -inf }
 0x1c5   :  { %v211_v57 = vrot.slane %v210_v56, 4 }
 0x1c7   :  { %v212_v58 = vmax.f32 %v210_v56, %v211_v57 }
 0x1c9   :  { %v213_v59 = vrot.slane %v212_v58, 2 }
 0x1cb   :  { %v214_v61 = vmax.f32 %v212_v58, %v213_v59 }
 0x1cd   :  { %v215_v62 = vrot.slane %v214_v61, 1 }
 0x1cf   :  { %v216_v0 = vmax.f32 %v214_v61, %v215_v62 }
 0x1d1   :  { %vm217_vm3 = vcmp.eq.f32.partialorder %v205_v55, %v216_v0 }
 0x1d2   :  { %v218_v1 = vsel %vm217_vm3, %v208_v63, 8 }
 0x1d3   :  { %v219_v2 = vsel %vm209_vm2, %v218_v1, 2147483647 }
 0x1d4   :  { %v220_v3 = vrot.slane %v219_v2, 4 }
 0x1d6   :  { %vm221_vm4 = vcmp.lt.s32.totalorder %v219_v2, %v220_v3 }
 0x1d7   :  { %v222_v4 = vsel %vm221_vm4, %v219_v2, %v220_v3 }
 0x1d8   :  { %v223_v5 = vrot.slane %v222_v4, 2 }
 0x1da   :  { %vm224_vm5 = vcmp.lt.s32.totalorder %v222_v4, %v223_v5 }
 0x1db   :  { %v225_v6 = vsel %vm224_vm5, %v222_v4, %v223_v5 }
 0x1dc   :  { %v226_v7 = vrot.slane %v225_v6, 1 }
 0x1de   :  { %vm227_vm7 = vcmp.lt.s32.totalorder %v225_v6, %v226_v7 }
 0x1df   :  { %v228_v8 = vsel %vm227_vm7, %v225_v6, %v226_v7 }
 0x1e0   :  { %230 = vst.msk [vmem:[#allocation2] sm:$0x1] %vm229_vm6, %v228_v8 }
 0x1e1   :  { %241 = dma.vmem_to_hbm [thread:$0]  %s237_s11, 16, %s239_s14, [#allocation3]  }
 0x1e2   :  { %311 = dma.done.wait [#allocation3], 16  }
 0x1e3   :  { %312 = vsyncadd [#allocation3], 4294967280 }
 0x1e4   :  { %246 = vsyncpa [#allocation3], 1 }

</bundles_post_ra>
